<compile_context>
chip_gen: v5e
topology: v5e:2x2
jax: 0.10.0
libtpu: 0.0.40
codegen_flags: <defaults>
</compile_context>

<pallas_src>
import jax
import jax.numpy as jnp
import numpy as np
from jax import lax
from jax.experimental import pallas as pl
from jax.experimental.pallas import tpu as pltpu


def _sigmoid_tanh(x):
    # sigmoid via tanh: a single EUP push (tanh) + cheap VPU ops instead of exp+recip.
    return 0.5 * jnp.tanh(0.5 * x) + 0.5


def _make_lstm_kernel(H, tc_full, tc_last, unroll_full, unroll_last, mm_dtype):
    """Build the per-chunk LSTM recurrence kernel (all trip counts static)."""

    def kernel(xp_ref, whh_ref, h_out_ref, h_scr, c_scr):
        # xp_ref : (tc, B, 4H) f32 -- precomputed x_t @ W_ih + (b_ih+b_hh), gates (i,f,o,g)
        # whh_ref: (H, 4H)         -- fused recurrent weights, gate order (i,f,o,g)
        # h_out_ref: (B, H) f32    -- hidden state after the final time step
        # h_scr, c_scr: (B, H) f32 -- recurrent state, persists across chunks
        chunk = pl.program_id(0)
        n_chunks = pl.num_programs(0)

        @pl.when(chunk == 0)
        def _():
            h_scr[...] = jnp.zeros_like(h_scr)
            c_scr[...] = jnp.zeros_like(c_scr)

        # Hoist the recurrent weights out of the time loop: one VMEM->vreg load per
        # chunk, loop-invariant across all (unrolled) steps.
        whh = whh_ref[...]

        def step(t, carry):
            h, c = carry
            # One fused (B,H)@(H,4H) MXU matmul per step, f32 accumulation.
            gates = xp_ref[t] + jnp.dot(h.astype(mm_dtype), whh,
                                        preferred_element_type=jnp.float32)
            ifo = _sigmoid_tanh(gates[:, : 3 * H])   # i, f, o gates in one EUP slab
            g_g = jnp.tanh(gates[:, 3 * H:])
            i_g = ifo[:, :H]
            f_g = ifo[:, H: 2 * H]
            o_g = ifo[:, 2 * H: 3 * H]
            c_new = f_g * c + i_g * g_g              # f32 state math (v5e-friendly)
            h_new = o_g * jnp.tanh(c_new)
            return h_new, c_new

        def run_steps(n_steps, unroll):
            h, c = lax.fori_loop(0, n_steps, step, (h_scr[...], c_scr[...]),
                                 unroll=unroll)
            h_scr[...] = h
            c_scr[...] = c

        if tc_last == tc_full:
            run_steps(tc_full, unroll_full)
        else:
            @pl.when(chunk < n_chunks - 1)
            def _():
                run_steps(tc_full, unroll_full)

            @pl.when(chunk == n_chunks - 1)
            def _():
                run_steps(tc_last, unroll_last)       # static remainder trip count

        @pl.when(chunk == n_chunks - 1)
        def _():
            h_out_ref[...] = h_scr[...]

    return kernel


def _pick_time_chunk(T, B, H, xp_itemsize, vmem_budget_bytes):
    """Largest time chunk whose double-buffered xp slab fits the VMEM budget."""
    per_step = B * 4 * H * xp_itemsize                               # one xp time step
    fixed = 2 * (H * 4 * H * 4) + 3 * (B * H * 4) + (1 << 20)        # W_hh x2 + state + slack
    avail = max(vmem_budget_bytes - fixed, 2 * per_step)
    tc = int(avail // (2 * per_step))                                # /2: double-buffered
    return max(1, min(T, 1024, tc))


def _pick_unroll(n_steps, B, H):
    """Unroll depth bounded so unrolled live intermediates stay well under ~48 vregs."""
    rows = max(B, 8)                                                 # sublane padding
    vregs_per_step = max(1, (rows * 4 * H) // (8 * 128)) * 4         # gates/ifo/g/state
    max_unroll = max(1, 40 // vregs_per_step)
    if n_steps <= max_unroll:
        return n_steps                                               # fully unroll short chunks
    return max(1, min(8, max_unroll))


def lstm_model_forward(x, params, *, time_chunk=None, matmul_dtype=jnp.float32,
                       vmem_budget_bytes=32 << 20, single_buffer_weights=False):
    """x: (B, T, I) float32. Returns (B,) float32, matching the PyTorch module."""
    B, T, I = x.shape
    wih = params["wih"]          # (I, 4H), gate order (i, f, o, g)
    whh = params["whh"]          # (H, 4H)
    b = params["b"]              # (4H,)
    wfc_t = params["wfc_t"]      # (H, 1)
    bfc = params["bfc"]          # (1, 1)
    H = whh.shape[0]

    # Non-recurrent input projection hoisted out of the serial recurrence: one big
    # lane-dense matmul producing xp directly in (T, B, 4H) layout.
    x_t = jnp.transpose(x, (1, 0, 2)).reshape(T * B, I)
    xp = (x_t @ wih).reshape(T, B, 4 * H) + b[None, None, :]

    tc = time_chunk if time_chunk is not None else _pick_time_chunk(
        T, B, H, xp.dtype.itemsize, vmem_budget_bytes)
    tc = max(1, min(int(tc), T))
    n_chunks = pl.cdiv(T, tc)
    tc_last = T - (n_chunks - 1) * tc          # static remainder; no tc | T requirement

    unroll_full = _pick_unroll(tc, B, H)
    unroll_last = _pick_unroll(tc_last, B, H)

    whh_k = whh.astype(matmul_dtype)           # bf16 MXU operands optional, f32 accumulate

    kernel = _make_lstm_kernel(H, tc, tc_last, unroll_full, unroll_last, whh_k.dtype)

    whh_spec_kwargs = {}
    if single_buffer_weights:
        # Constant index_map -> no need to double-buffer the weights (saves one W_hh
        # copy of VMEM; matters for large H on v7x's 64 MiB VMEM).
        whh_spec_kwargs["pipeline_mode"] = pl.Buffered(1)

    vmem_needed = (2 * tc * B * 4 * H * xp.dtype.itemsize          # double-buffered xp
                   + 2 * H * 4 * H * whh_k.dtype.itemsize          # W_hh (x2 buffers)
                   + 3 * B * H * 4                                 # h/c scratch + out
                   + (2 << 20))                                    # headroom
    vmem_limit = int(min(max(vmem_needed, 16 << 20), 96 << 20))

    h_last = pl.pallas_call(
        kernel,
        out_shape=jax.ShapeDtypeStruct((B, H), jnp.float32),
        grid_spec=pltpu.PrefetchScalarGridSpec(
            num_scalar_prefetch=0,
            grid=(n_chunks,),
            in_specs=[
                pl.BlockSpec((tc, B, 4 * H), lambda c: (c, 0, 0)),            # xp chunk
                pl.BlockSpec((H, 4 * H), lambda c: (0, 0), **whh_spec_kwargs),  # W_hh
            ],
            # Constant index_map => output block resident across the whole time axis;
            # written once on the last chunk.
            out_specs=pl.BlockSpec((B, H), lambda c: (0, 0)),
            scratch_shapes=[
                pltpu.VMEM((B, H), jnp.float32),   # h state
                pltpu.VMEM((B, H), jnp.float32),   # c state
            ],
        ),
        compiler_params=pltpu.CompilerParams(
            dimension_semantics=("arbitrary",),    # recurrence: sequential chunks
            vmem_limit_bytes=vmem_limit),
    )(xp, whh_k)

    # Tiny FC head (B,H)@(H,1) done in XLA: avoids an N=1 MXU matmul and a masked
    # (B, 1) partial store inside the kernel.
    out = h_last @ wfc_t + bfc
    return out.reshape(-1)


def init_params_torch_layout(key, input_size, hidden_size):
    """Deterministic init in PyTorch's native LSTM/Linear layout."""
    H = hidden_size
    k = 1.0 / np.sqrt(H)
    ks = jax.random.split(key, 6)
    return {
        "w_ih": jax.random.uniform(ks[0], (4 * H, input_size), jnp.float32, -k, k),
        "w_hh": jax.random.uniform(ks[1], (4 * H, H), jnp.float32, -k, k),
        "b_ih": jax.random.uniform(ks[2], (4 * H,), jnp.float32, -k, k),
        "b_hh": jax.random.uniform(ks[3], (4 * H,), jnp.float32, -k, k),
        "w_fc": jax.random.uniform(ks[4], (1, H), jnp.float32, -k, k),
        "b_fc": jax.random.uniform(ks[5], (1,), jnp.float32, -k, k),
    }


_GATE_PERM = (0, 1, 3, 2)   # PyTorch gate order (i, f, g, o) -> kernel order (i, f, o, g)


def prepare_params(p):
    """Convert PyTorch-layout params to the fused-gate kernel layout."""
    H = p["w_hh"].shape[1]
    I = p["w_ih"].shape[1]
    perm = jnp.asarray(_GATE_PERM)
    w_ih = p["w_ih"].reshape(4, H, I)[perm]            # (4, H_out, I)
    w_hh = p["w_hh"].reshape(4, H, H)[perm]            # (4, H_out, H_in)
    b = (p["b_ih"] + p["b_hh"]).reshape(4, H)[perm]    # (4, H)
    return {
        "wih": w_ih.transpose(2, 0, 1).reshape(I, 4 * H),   # (I, 4H)
        "whh": w_hh.transpose(2, 0, 1).reshape(H, 4 * H),   # (H_in, 4H)
        "b": b.reshape(4 * H),                              # (4H,)
        "wfc_t": p["w_fc"].T,                               # (H, 1)
        "bfc": p["b_fc"][None, :],                          # (1, 1)
    }


def lstm_model_reference(x, p):
    """Pure-JAX reference (PyTorch layout / semantics) for correctness checking."""
    H = p["w_hh"].shape[1]
    B = x.shape[0]
    wih_t, whh_t = p["w_ih"].T, p["w_hh"].T
    b = (p["b_ih"] + p["b_hh"])[None, :]
    h = jnp.zeros((B, H), jnp.float32)
    c = jnp.zeros((B, H), jnp.float32)

    def step(carry, x_t):
        h, c = carry
        gates = x_t @ wih_t + h @ whh_t + b
        i_g = jax.nn.sigmoid(gates[:, 0 * H:1 * H])
        f_g = jax.nn.sigmoid(gates[:, 1 * H:2 * H])
        g_g = jnp.tanh(gates[:, 2 * H:3 * H])
        o_g = jax.nn.sigmoid(gates[:, 3 * H:4 * H])
        c = f_g * c + i_g * g_g
        h = o_g * jnp.tanh(c)
        return (h, c), None

    (h, _), _ = jax.lax.scan(step, (h, c), jnp.transpose(x, (1, 0, 2)))
    return (h @ p["w_fc"].T + p["b_fc"][None, :]).reshape(-1)


if __name__ == "__main__":
    B, T, INPUT_SIZE, HIDDEN = 2, 8, 4, 32

    key = jax.random.PRNGKey(0)
    kx, kp, kx2 = jax.random.split(key, 3)
    x = jax.random.normal(kx, (B, T, INPUT_SIZE), jnp.float32)
    raw_params = init_params_torch_layout(kp, INPUT_SIZE, HIDDEN)
    params = prepare_params(raw_params)

    ref = jax.block_until_ready(lstm_model_reference(x, raw_params))

    # f32 path (tight match to reference; tanh-form sigmoid differs by ~1e-7/step)
    out = jax.block_until_ready(lstm_model_forward(x, params))
    assert out.shape == (B,)
    np.testing.assert_allclose(np.asarray(out), np.asarray(ref),
                               rtol=2e-5, atol=2e-5)

    # Non-divisible sequence length exercises the multi-chunk + remainder path
    # (the old tc | T requirement / tc=1 perf cliff is gone).
    T2 = 11
    x2 = jax.random.normal(kx2, (B, T2, INPUT_SIZE), jnp.float32)
    ref2 = jax.block_until_ready(lstm_model_reference(x2, raw_params))
    out2 = jax.block_until_ready(lstm_model_forward(x2, params, time_chunk=4))
    np.testing.assert_allclose(np.asarray(out2), np.asarray(ref2),
                               rtol=2e-5, atol=2e-5)

    # bf16 MXU-operand path (f32 accumulation, f32 state math) -> loose tolerance.
    out_bf16 = jax.block_until_ready(
        lstm_model_forward(x, params, matmul_dtype=jnp.bfloat16))
    np.testing.assert_allclose(np.asarray(out_bf16), np.asarray(ref),
                               rtol=5e-2, atol=5e-2)

    print("KERNEL_OK")
</pallas_src>

<mosaic_0001>
module attributes {stable_mosaic.version = 11 : i64} {
  func.func @kernel(%arg0: i32, %arg1: memref<8x2x128xf32, #tpu.memory_space<vmem>>, %arg2: memref<32x128xf32, #tpu.memory_space<vmem>>, %arg3: memref<2x32xf32, #tpu.memory_space<vmem>>, %arg4: memref<2x32xf32, #tpu.memory_space<vmem>>, %arg5: memref<2x32xf32, #tpu.memory_space<vmem>>) attributes {dimension_semantics = [#tpu.dimension_semantics<arbitrary>], iteration_bounds = array<i64: 1>, scalar_prefetch = 0 : i64, scratch_operands = 2 : i64, tpu.core_type = #tpu.core_type<tc>, window_params = [{transform_indices = @transform_0, window_bounds = array<i64: 8, 2, 128>}, {pipeline_mode = #tpu.pipeline_mode<synchronous>, transform_indices = @transform_1, window_bounds = array<i64: 32, 128>}, {pipeline_mode = #tpu.pipeline_mode<synchronous>, transform_indices = @transform_2, window_bounds = array<i64: 2, 32>}]} {
    %c0_i32 = arith.constant 0 : i32
    %0 = arith.cmpi eq, %arg0, %c0_i32 : i32
    %1 = arith.extui %0 : i1 to i32
    %c0_i32_0 = arith.constant 0 : i32
    %2 = arith.cmpi ne, %1, %c0_i32_0 : i32
    scf.if %2 {
      %cst_60 = arith.constant 0.000000e+00 : f32
      %195 = vector.broadcast %cst_60 : f32 to vector<2x32xf32>
      %c0_61 = arith.constant 0 : index
      %c0_62 = arith.constant 0 : index
      %196 = vector.load %arg4[%c0_61, %c0_62] : memref<2x32xf32, #tpu.memory_space<vmem>>, vector<2x32xf32>
      tpu.vector_store %arg4[%c0_61, %c0_62], %195 {strides = array<i32>} : memref<2x32xf32, #tpu.memory_space<vmem>>, vector<2x32xf32>,
      %cst_63 = arith.constant 0.000000e+00 : f32
      %197 = vector.broadcast %cst_63 : f32 to vector<2x32xf32>
      %c0_64 = arith.constant 0 : index
      %c0_65 = arith.constant 0 : index
      %198 = vector.load %arg5[%c0_64, %c0_65] : memref<2x32xf32, #tpu.memory_space<vmem>>, vector<2x32xf32>
      tpu.vector_store %arg5[%c0_64, %c0_65], %197 {strides = array<i32>} : memref<2x32xf32, #tpu.memory_space<vmem>>, vector<2x32xf32>,
    } else {
    }
    %c0 = arith.constant 0 : index
    %c0_1 = arith.constant 0 : index
    %3 = vector.load %arg2[%c0, %c0_1] : memref<32x128xf32, #tpu.memory_space<vmem>>, vector<32x128xf32>
    %c0_2 = arith.constant 0 : index
    %c0_3 = arith.constant 0 : index
    %4 = vector.load %arg4[%c0_2, %c0_3] : memref<2x32xf32, #tpu.memory_space<vmem>>, vector<2x32xf32>
    %c0_4 = arith.constant 0 : index
    %c0_5 = arith.constant 0 : index
    %5 = vector.load %arg5[%c0_4, %c0_5] : memref<2x32xf32, #tpu.memory_space<vmem>>, vector<2x32xf32>
    %c0_i32_6 = arith.constant 0 : i32
    %6 = arith.index_cast %c0_i32_6 : i32 to index
    %c0_7 = arith.constant 0 : index
    %c0_8 = arith.constant 0 : index
    %7 = vector.load %arg1[%6, %c0_7, %c0_8] : memref<8x2x128xf32, #tpu.memory_space<vmem>>, vector<1x2x128xf32>
    %8 = vector.shape_cast %7 : vector<1x2x128xf32> to vector<2x128xf32>
    %cst = arith.constant dense<0.000000e+00> : vector<2x128xf32>
    %9 = tpu.matmul %4, %3, %cst {dimension_numbers = #tpu.dot_dimension_numbers<[1], [0], [0], [1], [0, 0, 1, 1], [], []>} : vector<2x32xf32>, vector<32x128xf32>, vector<2x128xf32> -> vector<2x128xf32>
    %10 = arith.addf %8, %9 : vector<2x128xf32>
    %11 = vector.extract_strided_slice %10 {offsets = [0, 0], sizes = [2, 96], strides = [1, 1]} : vector<2x128xf32> to vector<2x96xf32>
    %cst_9 = arith.constant 5.000000e-01 : f32
    %12 = vector.broadcast %cst_9 : f32 to vector<2x96xf32>
    %13 = arith.mulf %12, %11 : vector<2x96xf32>
    %14 = math.tanh %13 : vector<2x96xf32>
    %cst_10 = arith.constant 5.000000e-01 : f32
    %15 = vector.broadcast %cst_10 : f32 to vector<2x96xf32>
    %16 = arith.mulf %15, %14 : vector<2x96xf32>
    %cst_11 = arith.constant 5.000000e-01 : f32
    %17 = vector.broadcast %cst_11 : f32 to vector<2x96xf32>
    %18 = arith.addf %16, %17 : vector<2x96xf32>
    %19 = vector.extract_strided_slice %10 {offsets = [0, 96], sizes = [2, 32], strides = [1, 1]} : vector<2x128xf32> to vector<2x32xf32>
    %20 = math.tanh %19 : vector<2x32xf32>
    %21 = vector.extract_strided_slice %18 {offsets = [0, 0], sizes = [2, 32], strides = [1, 1]} : vector<2x96xf32> to vector<2x32xf32>
    %22 = vector.extract_strided_slice %18 {offsets = [0, 32], sizes = [2, 32], strides = [1, 1]} : vector<2x96xf32> to vector<2x32xf32>
    %23 = vector.extract_strided_slice %18 {offsets = [0, 64], sizes = [2, 32], strides = [1, 1]} : vector<2x96xf32> to vector<2x32xf32>
    %24 = arith.mulf %22, %5 : vector<2x32xf32>
    %25 = arith.mulf %21, %20 : vector<2x32xf32>
    %26 = arith.addf %24, %25 : vector<2x32xf32>
    %27 = math.tanh %26 : vector<2x32xf32>
    %28 = arith.mulf %23, %27 : vector<2x32xf32>
    %c1_i32 = arith.constant 1 : i32
    %29 = arith.index_cast %c1_i32 : i32 to index
    %c0_12 = arith.constant 0 : index
    %c0_13 = arith.constant 0 : index
    %30 = vector.load %arg1[%29, %c0_12, %c0_13] : memref<8x2x128xf32, #tpu.memory_space<vmem>>, vector<1x2x128xf32>
    %31 = vector.shape_cast %30 : vector<1x2x128xf32> to vector<2x128xf32>
    %cst_14 = arith.constant dense<0.000000e+00> : vector<2x128xf32>
    %32 = tpu.matmul %28, %3, %cst_14 {dimension_numbers = #tpu.dot_dimension_numbers<[1], [0], [0], [1], [0, 0, 1, 1], [], []>} : vector<2x32xf32>, vector<32x128xf32>, vector<2x128xf32> -> vector<2x128xf32>
    %33 = arith.addf %31, %32 : vector<2x128xf32>
    %34 = vector.extract_strided_slice %33 {offsets = [0, 0], sizes = [2, 96], strides = [1, 1]} : vector<2x128xf32> to vector<2x96xf32>
    %cst_15 = arith.constant 5.000000e-01 : f32
    %35 = vector.broadcast %cst_15 : f32 to vector<2x96xf32>
    %36 = arith.mulf %35, %34 : vector<2x96xf32>
    %37 = math.tanh %36 : vector<2x96xf32>
    %cst_16 = arith.constant 5.000000e-01 : f32
    %38 = vector.broadcast %cst_16 : f32 to vector<2x96xf32>
    %39 = arith.mulf %38, %37 : vector<2x96xf32>
    %cst_17 = arith.constant 5.000000e-01 : f32
    %40 = vector.broadcast %cst_17 : f32 to vector<2x96xf32>
    %41 = arith.addf %39, %40 : vector<2x96xf32>
    %42 = vector.extract_strided_slice %33 {offsets = [0, 96], sizes = [2, 32], strides = [1, 1]} : vector<2x128xf32> to vector<2x32xf32>
    %43 = math.tanh %42 : vector<2x32xf32>
    %44 = vector.extract_strided_slice %41 {offsets = [0, 0], sizes = [2, 32], strides = [1, 1]} : vector<2x96xf32> to vector<2x32xf32>
    %45 = vector.extract_strided_slice %41 {offsets = [0, 32], sizes = [2, 32], strides = [1, 1]} : vector<2x96xf32> to vector<2x32xf32>
    %46 = vector.extract_strided_slice %41 {offsets = [0, 64], sizes = [2, 32], strides = [1, 1]} : vector<2x96xf32> to vector<2x32xf32>
    %47 = arith.mulf %45, %26 : vector<2x32xf32>
    %48 = arith.mulf %44, %43 : vector<2x32xf32>
    %49 = arith.addf %47, %48 : vector<2x32xf32>
    %50 = math.tanh %49 : vector<2x32xf32>
    %51 = arith.mulf %46, %50 : vector<2x32xf32>
    %c2_i32 = arith.constant 2 : i32
    %52 = arith.index_cast %c2_i32 : i32 to index
    %c0_18 = arith.constant 0 : index
    %c0_19 = arith.constant 0 : index
    %53 = vector.load %arg1[%52, %c0_18, %c0_19] : memref<8x2x128xf32, #tpu.memory_space<vmem>>, vector<1x2x128xf32>
    %54 = vector.shape_cast %53 : vector<1x2x128xf32> to vector<2x128xf32>
    %cst_20 = arith.constant dense<0.000000e+00> : vector<2x128xf32>
    %55 = tpu.matmul %51, %3, %cst_20 {dimension_numbers = #tpu.dot_dimension_numbers<[1], [0], [0], [1], [0, 0, 1, 1], [], []>} : vector<2x32xf32>, vector<32x128xf32>, vector<2x128xf32> -> vector<2x128xf32>
    %56 = arith.addf %54, %55 : vector<2x128xf32>
    %57 = vector.extract_strided_slice %56 {offsets = [0, 0], sizes = [2, 96], strides = [1, 1]} : vector<2x128xf32> to vector<2x96xf32>
    %cst_21 = arith.constant 5.000000e-01 : f32
    %58 = vector.broadcast %cst_21 : f32 to vector<2x96xf32>
    %59 = arith.mulf %58, %57 : vector<2x96xf32>
    %60 = math.tanh %59 : vector<2x96xf32>
    %cst_22 = arith.constant 5.000000e-01 : f32
    %61 = vector.broadcast %cst_22 : f32 to vector<2x96xf32>
    %62 = arith.mulf %61, %60 : vector<2x96xf32>
    %cst_23 = arith.constant 5.000000e-01 : f32
    %63 = vector.broadcast %cst_23 : f32 to vector<2x96xf32>
    %64 = arith.addf %62, %63 : vector<2x96xf32>
    %65 = vector.extract_strided_slice %56 {offsets = [0, 96], sizes = [2, 32], strides = [1, 1]} : vector<2x128xf32> to vector<2x32xf32>
    %66 = math.tanh %65 : vector<2x32xf32>
    %67 = vector.extract_strided_slice %64 {offsets = [0, 0], sizes = [2, 32], strides = [1, 1]} : vector<2x96xf32> to vector<2x32xf32>
    %68 = vector.extract_strided_slice %64 {offsets = [0, 32], sizes = [2, 32], strides = [1, 1]} : vector<2x96xf32> to vector<2x32xf32>
    %69 = vector.extract_strided_slice %64 {offsets = [0, 64], sizes = [2, 32], strides = [1, 1]} : vector<2x96xf32> to vector<2x32xf32>
    %70 = arith.mulf %68, %49 : vector<2x32xf32>
    %71 = arith.mulf %67, %66 : vector<2x32xf32>
    %72 = arith.addf %70, %71 : vector<2x32xf32>
    %73 = math.tanh %72 : vector<2x32xf32>
    %74 = arith.mulf %69, %73 : vector<2x32xf32>
    %c3_i32 = arith.constant 3 : i32
    %75 = arith.index_cast %c3_i32 : i32 to index
    %c0_24 = arith.constant 0 : index
    %c0_25 = arith.constant 0 : index
    %76 = vector.load %arg1[%75, %c0_24, %c0_25] : memref<8x2x128xf32, #tpu.memory_space<vmem>>, vector<1x2x128xf32>
    %77 = vector.shape_cast %76 : vector<1x2x128xf32> to vector<2x128xf32>
    %cst_26 = arith.constant dense<0.000000e+00> : vector<2x128xf32>
    %78 = tpu.matmul %74, %3, %cst_26 {dimension_numbers = #tpu.dot_dimension_numbers<[1], [0], [0], [1], [0, 0, 1, 1], [], []>} : vector<2x32xf32>, vector<32x128xf32>, vector<2x128xf32> -> vector<2x128xf32>
    %79 = arith.addf %77, %78 : vector<2x128xf32>
    %80 = vector.extract_strided_slice %79 {offsets = [0, 0], sizes = [2, 96], strides = [1, 1]} : vector<2x128xf32> to vector<2x96xf32>
    %cst_27 = arith.constant 5.000000e-01 : f32
    %81 = vector.broadcast %cst_27 : f32 to vector<2x96xf32>
    %82 = arith.mulf %81, %80 : vector<2x96xf32>
    %83 = math.tanh %82 : vector<2x96xf32>
    %cst_28 = arith.constant 5.000000e-01 : f32
    %84 = vector.broadcast %cst_28 : f32 to vector<2x96xf32>
    %85 = arith.mulf %84, %83 : vector<2x96xf32>
    %cst_29 = arith.constant 5.000000e-01 : f32
    %86 = vector.broadcast %cst_29 : f32 to vector<2x96xf32>
    %87 = arith.addf %85, %86 : vector<2x96xf32>
    %88 = vector.extract_strided_slice %79 {offsets = [0, 96], sizes = [2, 32], strides = [1, 1]} : vector<2x128xf32> to vector<2x32xf32>
    %89 = math.tanh %88 : vector<2x32xf32>
    %90 = vector.extract_strided_slice %87 {offsets = [0, 0], sizes = [2, 32], strides = [1, 1]} : vector<2x96xf32> to vector<2x32xf32>
    %91 = vector.extract_strided_slice %87 {offsets = [0, 32], sizes = [2, 32], strides = [1, 1]} : vector<2x96xf32> to vector<2x32xf32>
    %92 = vector.extract_strided_slice %87 {offsets = [0, 64], sizes = [2, 32], strides = [1, 1]} : vector<2x96xf32> to vector<2x32xf32>
    %93 = arith.mulf %91, %72 : vector<2x32xf32>
    %94 = arith.mulf %90, %89 : vector<2x32xf32>
    %95 = arith.addf %93, %94 : vector<2x32xf32>
    %96 = math.tanh %95 : vector<2x32xf32>
    %97 = arith.mulf %92, %96 : vector<2x32xf32>
    %c4_i32 = arith.constant 4 : i32
    %98 = arith.index_cast %c4_i32 : i32 to index
    %c0_30 = arith.constant 0 : index
    %c0_31 = arith.constant 0 : index
    %99 = vector.load %arg1[%98, %c0_30, %c0_31] : memref<8x2x128xf32, #tpu.memory_space<vmem>>, vector<1x2x128xf32>
    %100 = vector.shape_cast %99 : vector<1x2x128xf32> to vector<2x128xf32>
    %cst_32 = arith.constant dense<0.000000e+00> : vector<2x128xf32>
    %101 = tpu.matmul %97, %3, %cst_32 {dimension_numbers = #tpu.dot_dimension_numbers<[1], [0], [0], [1], [0, 0, 1, 1], [], []>} : vector<2x32xf32>, vector<32x128xf32>, vector<2x128xf32> -> vector<2x128xf32>
    %102 = arith.addf %100, %101 : vector<2x128xf32>
    %103 = vector.extract_strided_slice %102 {offsets = [0, 0], sizes = [2, 96], strides = [1, 1]} : vector<2x128xf32> to vector<2x96xf32>
    %cst_33 = arith.constant 5.000000e-01 : f32
    %104 = vector.broadcast %cst_33 : f32 to vector<2x96xf32>
    %105 = arith.mulf %104, %103 : vector<2x96xf32>
    %106 = math.tanh %105 : vector<2x96xf32>
    %cst_34 = arith.constant 5.000000e-01 : f32
    %107 = vector.broadcast %cst_34 : f32 to vector<2x96xf32>
    %108 = arith.mulf %107, %106 : vector<2x96xf32>
    %cst_35 = arith.constant 5.000000e-01 : f32
    %109 = vector.broadcast %cst_35 : f32 to vector<2x96xf32>
    %110 = arith.addf %108, %109 : vector<2x96xf32>
    %111 = vector.extract_strided_slice %102 {offsets = [0, 96], sizes = [2, 32], strides = [1, 1]} : vector<2x128xf32> to vector<2x32xf32>
    %112 = math.tanh %111 : vector<2x32xf32>
    %113 = vector.extract_strided_slice %110 {offsets = [0, 0], sizes = [2, 32], strides = [1, 1]} : vector<2x96xf32> to vector<2x32xf32>
    %114 = vector.extract_strided_slice %110 {offsets = [0, 32], sizes = [2, 32], strides = [1, 1]} : vector<2x96xf32> to vector<2x32xf32>
    %115 = vector.extract_strided_slice %110 {offsets = [0, 64], sizes = [2, 32], strides = [1, 1]} : vector<2x96xf32> to vector<2x32xf32>
    %116 = arith.mulf %114, %95 : vector<2x32xf32>
    %117 = arith.mulf %113, %112 : vector<2x32xf32>
    %118 = arith.addf %116, %117 : vector<2x32xf32>
    %119 = math.tanh %118 : vector<2x32xf32>
    %120 = arith.mulf %115, %119 : vector<2x32xf32>
    %c5_i32 = arith.constant 5 : i32
    %121 = arith.index_cast %c5_i32 : i32 to index
    %c0_36 = arith.constant 0 : index
    %c0_37 = arith.constant 0 : index
    %122 = vector.load %arg1[%121, %c0_36, %c0_37] : memref<8x2x128xf32, #tpu.memory_space<vmem>>, vector<1x2x128xf32>
    %123 = vector.shape_cast %122 : vector<1x2x128xf32> to vector<2x128xf32>
    %cst_38 = arith.constant dense<0.000000e+00> : vector<2x128xf32>
    %124 = tpu.matmul %120, %3, %cst_38 {dimension_numbers = #tpu.dot_dimension_numbers<[1], [0], [0], [1], [0, 0, 1, 1], [], []>} : vector<2x32xf32>, vector<32x128xf32>, vector<2x128xf32> -> vector<2x128xf32>
    %125 = arith.addf %123, %124 : vector<2x128xf32>
    %126 = vector.extract_strided_slice %125 {offsets = [0, 0], sizes = [2, 96], strides = [1, 1]} : vector<2x128xf32> to vector<2x96xf32>
    %cst_39 = arith.constant 5.000000e-01 : f32
    %127 = vector.broadcast %cst_39 : f32 to vector<2x96xf32>
    %128 = arith.mulf %127, %126 : vector<2x96xf32>
    %129 = math.tanh %128 : vector<2x96xf32>
    %cst_40 = arith.constant 5.000000e-01 : f32
    %130 = vector.broadcast %cst_40 : f32 to vector<2x96xf32>
    %131 = arith.mulf %130, %129 : vector<2x96xf32>
    %cst_41 = arith.constant 5.000000e-01 : f32
    %132 = vector.broadcast %cst_41 : f32 to vector<2x96xf32>
    %133 = arith.addf %131, %132 : vector<2x96xf32>
    %134 = vector.extract_strided_slice %125 {offsets = [0, 96], sizes = [2, 32], strides = [1, 1]} : vector<2x128xf32> to vector<2x32xf32>
    %135 = math.tanh %134 : vector<2x32xf32>
    %136 = vector.extract_strided_slice %133 {offsets = [0, 0], sizes = [2, 32], strides = [1, 1]} : vector<2x96xf32> to vector<2x32xf32>
    %137 = vector.extract_strided_slice %133 {offsets = [0, 32], sizes = [2, 32], strides = [1, 1]} : vector<2x96xf32> to vector<2x32xf32>
    %138 = vector.extract_strided_slice %133 {offsets = [0, 64], sizes = [2, 32], strides = [1, 1]} : vector<2x96xf32> to vector<2x32xf32>
    %139 = arith.mulf %137, %118 : vector<2x32xf32>
    %140 = arith.mulf %136, %135 : vector<2x32xf32>
    %141 = arith.addf %139, %140 : vector<2x32xf32>
    %142 = math.tanh %141 : vector<2x32xf32>
    %143 = arith.mulf %138, %142 : vector<2x32xf32>
    %c6_i32 = arith.constant 6 : i32
    %144 = arith.index_cast %c6_i32 : i32 to index
    %c0_42 = arith.constant 0 : index
    %c0_43 = arith.constant 0 : index
    %145 = vector.load %arg1[%144, %c0_42, %c0_43] : memref<8x2x128xf32, #tpu.memory_space<vmem>>, vector<1x2x128xf32>
    %146 = vector.shape_cast %145 : vector<1x2x128xf32> to vector<2x128xf32>
    %cst_44 = arith.constant dense<0.000000e+00> : vector<2x128xf32>
    %147 = tpu.matmul %143, %3, %cst_44 {dimension_numbers = #tpu.dot_dimension_numbers<[1], [0], [0], [1], [0, 0, 1, 1], [], []>} : vector<2x32xf32>, vector<32x128xf32>, vector<2x128xf32> -> vector<2x128xf32>
    %148 = arith.addf %146, %147 : vector<2x128xf32>
    %149 = vector.extract_strided_slice %148 {offsets = [0, 0], sizes = [2, 96], strides = [1, 1]} : vector<2x128xf32> to vector<2x96xf32>
    %cst_45 = arith.constant 5.000000e-01 : f32
    %150 = vector.broadcast %cst_45 : f32 to vector<2x96xf32>
    %151 = arith.mulf %150, %149 : vector<2x96xf32>
    %152 = math.tanh %151 : vector<2x96xf32>
    %cst_46 = arith.constant 5.000000e-01 : f32
    %153 = vector.broadcast %cst_46 : f32 to vector<2x96xf32>
    %154 = arith.mulf %153, %152 : vector<2x96xf32>
    %cst_47 = arith.constant 5.000000e-01 : f32
    %155 = vector.broadcast %cst_47 : f32 to vector<2x96xf32>
    %156 = arith.addf %154, %155 : vector<2x96xf32>
    %157 = vector.extract_strided_slice %148 {offsets = [0, 96], sizes = [2, 32], strides = [1, 1]} : vector<2x128xf32> to vector<2x32xf32>
    %158 = math.tanh %157 : vector<2x32xf32>
    %159 = vector.extract_strided_slice %156 {offsets = [0, 0], sizes = [2, 32], strides = [1, 1]} : vector<2x96xf32> to vector<2x32xf32>
    %160 = vector.extract_strided_slice %156 {offsets = [0, 32], sizes = [2, 32], strides = [1, 1]} : vector<2x96xf32> to vector<2x32xf32>
    %161 = vector.extract_strided_slice %156 {offsets = [0, 64], sizes = [2, 32], strides = [1, 1]} : vector<2x96xf32> to vector<2x32xf32>
    %162 = arith.mulf %160, %141 : vector<2x32xf32>
    %163 = arith.mulf %159, %158 : vector<2x32xf32>
    %164 = arith.addf %162, %163 : vector<2x32xf32>
    %165 = math.tanh %164 : vector<2x32xf32>
    %166 = arith.mulf %161, %165 : vector<2x32xf32>
    %c7_i32 = arith.constant 7 : i32
    %167 = arith.index_cast %c7_i32 : i32 to index
    %c0_48 = arith.constant 0 : index
    %c0_49 = arith.constant 0 : index
    %168 = vector.load %arg1[%167, %c0_48, %c0_49] : memref<8x2x128xf32, #tpu.memory_space<vmem>>, vector<1x2x128xf32>
    %169 = vector.shape_cast %168 : vector<1x2x128xf32> to vector<2x128xf32>
    %cst_50 = arith.constant dense<0.000000e+00> : vector<2x128xf32>
    %170 = tpu.matmul %166, %3, %cst_50 {dimension_numbers = #tpu.dot_dimension_numbers<[1], [0], [0], [1], [0, 0, 1, 1], [], []>} : vector<2x32xf32>, vector<32x128xf32>, vector<2x128xf32> -> vector<2x128xf32>
    %171 = arith.addf %169, %170 : vector<2x128xf32>
    %172 = vector.extract_strided_slice %171 {offsets = [0, 0], sizes = [2, 96], strides = [1, 1]} : vector<2x128xf32> to vector<2x96xf32>
    %cst_51 = arith.constant 5.000000e-01 : f32
    %173 = vector.broadcast %cst_51 : f32 to vector<2x96xf32>
    %174 = arith.mulf %173, %172 : vector<2x96xf32>
    %175 = math.tanh %174 : vector<2x96xf32>
    %cst_52 = arith.constant 5.000000e-01 : f32
    %176 = vector.broadcast %cst_52 : f32 to vector<2x96xf32>
    %177 = arith.mulf %176, %175 : vector<2x96xf32>
    %cst_53 = arith.constant 5.000000e-01 : f32
    %178 = vector.broadcast %cst_53 : f32 to vector<2x96xf32>
    %179 = arith.addf %177, %178 : vector<2x96xf32>
    %180 = vector.extract_strided_slice %171 {offsets = [0, 96], sizes = [2, 32], strides = [1, 1]} : vector<2x128xf32> to vector<2x32xf32>
    %181 = math.tanh %180 : vector<2x32xf32>
    %182 = vector.extract_strided_slice %179 {offsets = [0, 0], sizes = [2, 32], strides = [1, 1]} : vector<2x96xf32> to vector<2x32xf32>
    %183 = vector.extract_strided_slice %179 {offsets = [0, 32], sizes = [2, 32], strides = [1, 1]} : vector<2x96xf32> to vector<2x32xf32>
    %184 = vector.extract_strided_slice %179 {offsets = [0, 64], sizes = [2, 32], strides = [1, 1]} : vector<2x96xf32> to vector<2x32xf32>
    %185 = arith.mulf %183, %164 : vector<2x32xf32>
    %186 = arith.mulf %182, %181 : vector<2x32xf32>
    %187 = arith.addf %185, %186 : vector<2x32xf32>
    %188 = math.tanh %187 : vector<2x32xf32>
    %189 = arith.mulf %184, %188 : vector<2x32xf32>
    %c8_i32 = arith.constant 8 : i32
    %c0_54 = arith.constant 0 : index
    %c0_55 = arith.constant 0 : index
    %190 = vector.load %arg4[%c0_54, %c0_55] : memref<2x32xf32, #tpu.memory_space<vmem>>, vector<2x32xf32>
    tpu.vector_store %arg4[%c0_54, %c0_55], %189 {strides = array<i32>} : memref<2x32xf32, #tpu.memory_space<vmem>>, vector<2x32xf32>,
    %c0_56 = arith.constant 0 : index
    %c0_57 = arith.constant 0 : index
    %191 = vector.load %arg5[%c0_56, %c0_57] : memref<2x32xf32, #tpu.memory_space<vmem>>, vector<2x32xf32>
    tpu.vector_store %arg5[%c0_56, %c0_57], %187 {strides = array<i32>} : memref<2x32xf32, #tpu.memory_space<vmem>>, vector<2x32xf32>,
    %c0_i32_58 = arith.constant 0 : i32
    %192 = arith.cmpi eq, %arg0, %c0_i32_58 : i32
    %193 = arith.extui %192 : i1 to i32
    %c0_i32_59 = arith.constant 0 : i32
    %194 = arith.cmpi ne, %193, %c0_i32_59 : i32
    scf.if %194 {
      %c0_60 = arith.constant 0 : index
      %c0_61 = arith.constant 0 : index
      %195 = vector.load %arg4[%c0_60, %c0_61] : memref<2x32xf32, #tpu.memory_space<vmem>>, vector<2x32xf32>
      %c0_62 = arith.constant 0 : index
      %c0_63 = arith.constant 0 : index
      %196 = vector.load %arg3[%c0_62, %c0_63] : memref<2x32xf32, #tpu.memory_space<vmem>>, vector<2x32xf32>
      tpu.vector_store %arg3[%c0_62, %c0_63], %195 {strides = array<i32>} : memref<2x32xf32, #tpu.memory_space<vmem>>, vector<2x32xf32>,
    } else {
    }
    return
  }
  func.func @transform_0(%arg0: i32) -> (i32, i32, i32) {
    %c0_i32 = arith.constant 0 : i32
    %c0_i32_0 = arith.constant 0 : i32
    %c0_i32_1 = arith.constant 0 : i32
    return %arg0, %c0_i32, %c0_i32_0 : i32, i32, i32
  }
  func.func @transform_1(%arg0: i32) -> (i32, i32) {
    %c0_i32 = arith.constant 0 : i32
    %c0_i32_0 = arith.constant 0 : i32
    %c0_i32_1 = arith.constant 0 : i32
    return %c0_i32, %c0_i32_0 : i32, i32
  }
  func.func @transform_2(%arg0: i32) -> (i32, i32) {
    %c0_i32 = arith.constant 0 : i32
    %c0_i32_0 = arith.constant 0 : i32
    %c0_i32_1 = arith.constant 0 : i32
    return %c0_i32, %c0_i32_0 : i32, i32
  }
}

</mosaic_0001>

<bundles_post_ra>
// kernel: tpu_custom_call.1
= control target key start
LH: loop header
LB: loop body
LE: loop exit
PB: predicated region body
PF: predicated region fallthrough
CT: control target
= control target key end

     0   :  { %7 = vsyncpa [#allocation5], 0  ;;  %s719_s0 = inlined_call_operand.hbm [shape: f32[8,2,128], index: 0, kind: input, shape index: {}]   ;;  %s720_s1 = inlined_call_operand.hbm [shape: f32[32,128], index: 1, kind: input, shape index: {}]   ;;  %s721_s2 = inlined_call_operand.hbm [shape: f32[2,32], index: 2, kind: output, shape index: {}]  }
   0x1   :  { %8 = vsyncpa [#allocation8], 0 }
   0x2   :  { %9 = vsyncpa [#allocation6], 0  ;;  %s14_s11 = sshll.u32 %s719_s0, 4  ;;  %s637_s12 = smov [#allocation4]   ;;  %s15_s11 = int_to_ptr.hbm [resolvable:$true] %s14_s11 }
   0x3   :  { %s16_s13 = sshll.u32 %s637_s12, 4  ;;  %s27_s16 = sshll.u32 %s720_s1, 4  ;;  %s17_s13 = int_to_ptr.vmem [resolvable:$true] %s16_s13  ;;  %s28_s16 = int_to_ptr.hbm [resolvable:$true] %s27_s16 }
   0x4   :  { %s638_s17 = smov 32   ;;  %s639_s18 = smov 2  }
   0x5   :  { %22 = dma.hbm_to_vmem [thread:$0]  %s15_s11, 256, %s17_s13, [#allocation5], %s638_s17, %s638_s17, %s639_s18  }
   0x6   :  { %s640_s19 = smov [#allocation7]   ;;  %s641_s21 = smov 128  }
   0x7   :  { %s29_s20 = sshll.u32 %s640_s19, 4  ;;  %s642_s22 = smov 8   ;;  %s30_s20 = int_to_ptr.vmem [resolvable:$true] %s29_s20 }
   0x8   :  { %35 = dma.hbm_to_vmem [thread:$0]  %s28_s16, 512, %s30_s20, [#allocation8], %s641_s21, %s641_s21, %s642_s22  }
   0x9   :  { %631 = dma.done.wait [#allocation5], 256  }
   0xa   :  { %632 = vsyncadd [#allocation5], 4294967040 }
   0xb   :  { %633 = dma.done.wait [#allocation8], 512  }
   0xc   :  { %634 = vsyncadd [#allocation8], 4294966784  ;;  %vm48_vm0 = vcmask 254976   ;;  %v643_v0 = vmov 0.0   ;;  %v54_v1 = vld [vmem:[#allocation7 + $0x18] sm:$0xff]  ;;  %v53_v2 = vld [vmem:[#allocation7 + $0x10] sm:$0xff] }
   0xd   :  { %49 = vst.msk [vmem:[#allocation2] sm:$0x3] %vm48_vm0, %v643_v0  ;;  %74 = vmatpush.msra.mxu0 %v54_v1  ;;  %128 = vmatpush.msra.mxu1 %v54_v1  ;;  %v52_v3 = vld [vmem:[#allocation7 + $0x8] sm:$0xff]  ;;  %v51_v4 = vld [vmem:[#allocation7] sm:$0xff]  ;;  %vm58_vm1 = vcmask 261120   ;;  %s644_s0 = smov 64  }
   0xe   :  { %50 = vst.msk [vmem:[#allocation3] sm:$0x3] %vm48_vm0, %v643_v0  ;;  %178 = vmatpush.msra.mxu2 %v54_v1  ;;  %228 = vmatpush.msra.mxu3 %v54_v1  ;;  %v57_v6 = vld [vmem:[#allocation4] sm:$0x3]  ;;  %v110_v25 = vld [vmem:[#allocation4 + $0x2] sm:$0x3] }
   0xf   :  { %75 = vmatpush.msra.mxu0 %v53_v2  ;;  %129 = vmatpush.msra.mxu1 %v53_v2  ;;  %v160_v42 = vld [vmem:[#allocation4 + $0x4] sm:$0x3]  ;;  %v210_v59 = vld [vmem:[#allocation4 + $0x6] sm:$0x3]  ;;  %s645_s1 = smov 96   ;;  %s646_s23 = smov [#allocation9]  }
  0x10   :  { %179 = vmatpush.msra.mxu2 %v53_v2  ;;  %229 = vmatpush.msra.mxu3 %v53_v2  ;;  %s480_s24 = sshll.u32 %s646_s23, 4  ;;  %s482_s27 = sshll.u32 %s721_s2, 4  ;;  %s481_s24 = int_to_ptr.vmem [resolvable:$true] %s480_s24  ;;  %s483_s27 = int_to_ptr.hbm [resolvable:$true] %s482_s27 }
  0x11   :  { %76 = vmatpush.msra.mxu0 %v52_v3  ;;  %130 = vmatpush.msra.mxu1 %v52_v3 }
  0x12   :  { %180 = vmatpush.msra.mxu2 %v52_v3  ;;  %230 = vmatpush.msra.mxu3 %v52_v3 }
  0x13   :  { %77 = vmatpush.msra.mxu0 %v51_v4  ;;  %131 = vmatpush.msra.mxu1 %v51_v4 }
  0x14   :  { %v55_v5 = vld [vmem:[#allocation2] sm:$0x3]  ;;  %181 = vmatpush.msra.mxu2 %v51_v4  ;;  %231 = vmatpush.msra.mxu3 %v51_v4 }
  0x15   :  { %493 = vmatmul.msk.f32.vlgmr.msra.gmra.mxu0 %vm58_vm1, %v55_v5  ;;  %328 = vmatpush.msrb.mxu1 %v54_v1  ;;  %v56_v10 = vld [vmem:[#allocation3] sm:$0x3] }
  0x16   :  { %278 = vmatpush.msrb.mxu0 %v54_v1  ;;  %378 = vmatpush.msrb.mxu2 %v54_v1 }
  0x17   :  { %428 = vmatpush.msrb.mxu3 %v54_v1  ;;  %329 = vmatpush.msrb.mxu1 %v53_v2 }
  0x18   :  { %279 = vmatpush.msrb.mxu0 %v53_v2  ;;  %379 = vmatpush.msrb.mxu2 %v53_v2 }
  0x19   :  { %429 = vmatpush.msrb.mxu3 %v53_v2  ;;  %330 = vmatpush.msrb.mxu1 %v52_v3 }
  0x1a   :  { %280 = vmatpush.msrb.mxu0 %v52_v3  ;;  %380 = vmatpush.msrb.mxu2 %v52_v3 }
  0x1b   :  { %430 = vmatpush.msrb.mxu3 %v52_v3  ;;  %331 = vmatpush.msrb.mxu1 %v51_v4 }
  0x1c   :  { %281 = vmatpush.msrb.mxu0 %v51_v4  ;;  %381 = vmatpush.msrb.mxu2 %v51_v4 }
  0x1d   :  { %431 = vmatpush.msrb.mxu3 %v51_v4 }
  0x92   :  { %v79_v7 = vpop.f32.mrf.mxu0 }
  0x93   :  { %v82_v8 = vadd.f32 %v79_v7, %v57_v6 }
  0x95   :  { %511 = vtanh.f32 %v82_v8  ;;  %v83_v11 = vmul.f32 0.5, %v82_v8 }
  0x97   :  { %513 = vtanh.f32 %v83_v11 }
  0x9b   :  { %v512_v9 = vpop.eup %511 }
  0x9c   :  { %94 = vrot.lane.b32.xlu0 %v512_v9, %s638_s17 }
  0x9d   :  { %v514_v12 = vpop.eup %513 }
  0x9e   :  { %v85_v13 = vmul.f32 0.5, %v514_v12  ;;  %v260_v12 = vld [vmem:[#allocation4 + $0x8] sm:$0x3] }
  0xa0   :  { %v86_v14 = vadd.f32 0.5, %v85_v13 }
  0xa4   :  { %89 = vrot.lane.b32.xlu0 %v56_v10, %s638_s17 }
 0x10e   :  { %v95_v15 = vpop.permute.xlu0 %94 }
 0x10f   :  { %v97_v16 = vmul.f32 %v95_v15, %v86_v14 }
 0x111   :  { %99 = vrot.lane.b32.xlu1 %v97_v16, %s638_s17 }
 0x116   :  { %v90_v17 = vpop.permute.xlu0 %89 }
 0x117   :  { %v92_v18 = vmul.f32 %v90_v17, %v86_v14 }
 0x183   :  { %v100_v19 = vpop.permute.xlu1 %99 }
 0x184   :  { %v102_v20 = vadd.f32 %v100_v19, %v92_v18 }
 0x186   :  { %515 = vtanh.f32 %v102_v20 }
 0x18c   :  { %v516_v21 = vpop.eup %515 }
 0x18d   :  { %105 = vrot.lane.b32.xlu1 %v516_v21, %s638_s17 }
 0x1ff   :  { %v106_v22 = vpop.permute.xlu1 %105 }
 0x200   :  { %v108_v23 = vmul.f32 %v106_v22, %v86_v14 }
 0x202   :  { %112 = vrot.lane.b32.xlu2 %v108_v23, %s644_s0 }
 0x25c   :  { %v113_v24 = vpop.permute.xlu2 %112 }
 0x25d   :  { %494 = vmatmul.msk.f32.vlgmr.msra.gmra.mxu1 %vm58_vm1, %v113_v24 }
 0x2da   :  { %v133_v26 = vpop.f32.mrf.mxu1 }
 0x2db   :  { %v136_v27 = vadd.f32 %v133_v26, %v110_v25 }
 0x2dd   :  { %517 = vtanh.f32 %v136_v27  ;;  %v137_v29 = vmul.f32 0.5, %v136_v27 }
 0x2df   :  { %519 = vtanh.f32 %v137_v29  ;;  %v310_v29 = vld [vmem:[#allocation4 + $0xa] sm:$0x3] }
 0x2e3   :  { %v518_v28 = vpop.eup %517 }
 0x2e4   :  { %144 = vrot.lane.b32.xlu2 %v518_v28, %s638_s17 }
 0x2e5   :  { %v520_v30 = vpop.eup %519 }
 0x2e6   :  { %v139_v31 = vmul.f32 0.5, %v520_v30 }
 0x2e8   :  { %v140_v32 = vadd.f32 0.5, %v139_v31 }
 0x2ea   :  { %v142_v35 = vmul.f32 %v140_v32, %v102_v20 }
 0x33e   :  { %v145_v33 = vpop.permute.xlu2 %144 }
 0x33f   :  { %v147_v34 = vmul.f32 %v145_v33, %v140_v32 }
 0x341   :  { %149 = vrot.lane.b32.xlu0 %v147_v34, %s638_s17 }
 0x3b3   :  { %v150_v36 = vpop.permute.xlu0 %149 }
 0x3b4   :  { %v152_v37 = vadd.f32 %v150_v36, %v142_v35 }
 0x3b6   :  { %521 = vtanh.f32 %v152_v37 }
 0x3bc   :  { %v522_v38 = vpop.eup %521 }
 0x3bd   :  { %155 = vrot.lane.b32.xlu1 %v522_v38, %s638_s17 }
 0x42f   :  { %v156_v39 = vpop.permute.xlu1 %155 }
 0x430   :  { %v158_v40 = vmul.f32 %v156_v39, %v140_v32 }
 0x432   :  { %162 = vrot.lane.b32.xlu2 %v158_v40, %s644_s0 }
 0x48c   :  { %v163_v41 = vpop.permute.xlu2 %162 }
 0x48d   :  { %495 = vmatmul.msk.f32.vlgmr.msra.gmra.mxu2 %vm58_vm1, %v163_v41 }
 0x510   :  { %v183_v43 = vpop.f32.mrf.mxu2 }
 0x511   :  { %v186_v44 = vadd.f32 %v183_v43, %v160_v42 }
 0x513   :  { %523 = vtanh.f32 %v186_v44  ;;  %v187_v46 = vmul.f32 0.5, %v186_v44 }
 0x515   :  { %525 = vtanh.f32 %v187_v46  ;;  %v360_v46 = vld [vmem:[#allocation4 + $0xc] sm:$0x3] }
 0x519   :  { %v524_v45 = vpop.eup %523 }
 0x51a   :  { %194 = vrot.lane.b32.xlu0 %v524_v45, %s638_s17 }
 0x51b   :  { %v526_v47 = vpop.eup %525 }
 0x51c   :  { %v189_v48 = vmul.f32 0.5, %v526_v47 }
 0x51e   :  { %v190_v49 = vadd.f32 0.5, %v189_v48 }
 0x520   :  { %v192_v52 = vmul.f32 %v190_v49, %v152_v37 }
 0x58c   :  { %v195_v50 = vpop.permute.xlu0 %194 }
 0x58d   :  { %v197_v51 = vmul.f32 %v195_v50, %v190_v49 }
 0x58f   :  { %199 = vrot.lane.b32.xlu1 %v197_v51, %s638_s17 }
 0x601   :  { %v200_v53 = vpop.permute.xlu1 %199 }
 0x602   :  { %v202_v54 = vadd.f32 %v200_v53, %v192_v52 }
 0x604   :  { %527 = vtanh.f32 %v202_v54 }
 0x60a   :  { %v528_v55 = vpop.eup %527 }
 0x60b   :  { %205 = vrot.lane.b32.xlu2 %v528_v55, %s638_s17 }
 0x665   :  { %v206_v56 = vpop.permute.xlu2 %205 }
 0x666   :  { %v208_v57 = vmul.f32 %v206_v56, %v190_v49 }
 0x668   :  { %212 = vrot.lane.b32.xlu0 %v208_v57, %s644_s0 }
 0x6da   :  { %v213_v58 = vpop.permute.xlu0 %212 }
 0x6db   :  { %496 = vmatmul.msk.f32.vlgmr.msra.gmra.mxu3 %vm58_vm1, %v213_v58 }
 0x75e   :  { %v233_v60 = vpop.f32.mrf.mxu3 }
 0x75f   :  { %v236_v61 = vadd.f32 %v233_v60, %v210_v59 }
 0x761   :  { %529 = vtanh.f32 %v236_v61  ;;  %v237_v63 = vmul.f32 0.5, %v236_v61 }
 0x763   :  { %531 = vtanh.f32 %v237_v63  ;;  %v410_v63 = vld [vmem:[#allocation4 + $0xe] sm:$0x3] }
 0x767   :  { %v530_v62 = vpop.eup %529 }
 0x768   :  { %244 = vrot.lane.b32.xlu1 %v530_v62, %s638_s17 }
 0x769   :  { %v532_v0 = vpop.eup %531 }
 0x76a   :  { %v239_v1 = vmul.f32 0.5, %v532_v0 }
 0x76c   :  { %v240_v2 = vadd.f32 0.5, %v239_v1 }
 0x76e   :  { %v242_v5 = vmul.f32 %v240_v2, %v202_v54 }
 0x7da   :  { %v245_v3 = vpop.permute.xlu1 %244 }
 0x7db   :  { %v247_v4 = vmul.f32 %v245_v3, %v240_v2 }
 0x7dd   :  { %249 = vrot.lane.b32.xlu2 %v247_v4, %s638_s17 }
 0x837   :  { %v250_v6 = vpop.permute.xlu2 %249 }
 0x838   :  { %v252_v7 = vadd.f32 %v250_v6, %v242_v5 }
 0x83a   :  { %533 = vtanh.f32 %v252_v7 }
 0x840   :  { %v534_v8 = vpop.eup %533 }
 0x841   :  { %255 = vrot.lane.b32.xlu0 %v534_v8, %s638_s17 }
 0x8b3   :  { %v256_v9 = vpop.permute.xlu0 %255 }
 0x8b4   :  { %v258_v10 = vmul.f32 %v256_v9, %v240_v2 }
 0x8b6   :  { %262 = vrot.lane.b32.xlu1 %v258_v10, %s644_s0 }
 0x928   :  { %v263_v11 = vpop.permute.xlu1 %262 }
 0x929   :  { %497 = vmatmul.msk.f32.vlgmr.msrb.gmra.mxu0 %vm58_vm1, %v263_v11 }
 0x9a6   :  { %v283_v13 = vpop.f32.mrf.mxu0 }
 0x9a7   :  { %v286_v14 = vadd.f32 %v283_v13, %v260_v12 }
 0x9a9   :  { %535 = vtanh.f32 %v286_v14  ;;  %v287_v16 = vmul.f32 0.5, %v286_v14 }
 0x9ab   :  { %537 = vtanh.f32 %v287_v16 }
 0x9af   :  { %v536_v15 = vpop.eup %535 }
 0x9b0   :  { %294 = vrot.lane.b32.xlu2 %v536_v15, %s638_s17 }
 0x9b1   :  { %v538_v17 = vpop.eup %537 }
 0x9b2   :  { %v289_v18 = vmul.f32 0.5, %v538_v17 }
 0x9b4   :  { %v290_v19 = vadd.f32 0.5, %v289_v18 }
 0x9b6   :  { %v292_v22 = vmul.f32 %v290_v19, %v252_v7 }
 0xa0a   :  { %v295_v20 = vpop.permute.xlu2 %294 }
 0xa0b   :  { %v297_v21 = vmul.f32 %v295_v20, %v290_v19 }
 0xa0d   :  { %299 = vrot.lane.b32.xlu0 %v297_v21, %s638_s17 }
 0xa7f   :  { %v300_v23 = vpop.permute.xlu0 %299 }
 0xa80   :  { %v302_v24 = vadd.f32 %v300_v23, %v292_v22 }
 0xa82   :  { %539 = vtanh.f32 %v302_v24 }
 0xa88   :  { %v540_v25 = vpop.eup %539 }
 0xa89   :  { %305 = vrot.lane.b32.xlu1 %v540_v25, %s638_s17 }
 0xafb   :  { %v306_v26 = vpop.permute.xlu1 %305 }
 0xafc   :  { %v308_v27 = vmul.f32 %v306_v26, %v290_v19 }
 0xafe   :  { %312 = vrot.lane.b32.xlu2 %v308_v27, %s644_s0 }
 0xb58   :  { %v313_v28 = vpop.permute.xlu2 %312 }
 0xb59   :  { %498 = vmatmul.msk.f32.vlgmr.msrb.gmra.mxu1 %vm58_vm1, %v313_v28 }
 0xbd6   :  { %v333_v30 = vpop.f32.mrf.mxu1 }
 0xbd7   :  { %v336_v31 = vadd.f32 %v333_v30, %v310_v29 }
 0xbd9   :  { %541 = vtanh.f32 %v336_v31  ;;  %v337_v33 = vmul.f32 0.5, %v336_v31 }
 0xbdb   :  { %543 = vtanh.f32 %v337_v33 }
 0xbdf   :  { %v542_v32 = vpop.eup %541 }
 0xbe0   :  { %344 = vrot.lane.b32.xlu0 %v542_v32, %s638_s17 }
 0xbe1   :  { %v544_v34 = vpop.eup %543 }
 0xbe2   :  { %v339_v35 = vmul.f32 0.5, %v544_v34 }
 0xbe4   :  { %v340_v36 = vadd.f32 0.5, %v339_v35 }
 0xbe6   :  { %v342_v39 = vmul.f32 %v340_v36, %v302_v24 }
 0xc52   :  { %v345_v37 = vpop.permute.xlu0 %344 }
 0xc53   :  { %v347_v38 = vmul.f32 %v345_v37, %v340_v36 }
 0xc55   :  { %349 = vrot.lane.b32.xlu1 %v347_v38, %s638_s17 }
 0xcc7   :  { %v350_v40 = vpop.permute.xlu1 %349 }
 0xcc8   :  { %v352_v41 = vadd.f32 %v350_v40, %v342_v39 }
 0xcca   :  { %545 = vtanh.f32 %v352_v41 }
 0xcd0   :  { %v546_v42 = vpop.eup %545 }
 0xcd1   :  { %355 = vrot.lane.b32.xlu2 %v546_v42, %s638_s17 }
 0xd2b   :  { %v356_v43 = vpop.permute.xlu2 %355 }
 0xd2c   :  { %v358_v44 = vmul.f32 %v356_v43, %v340_v36 }
 0xd2e   :  { %362 = vrot.lane.b32.xlu0 %v358_v44, %s644_s0 }
 0xda0   :  { %v363_v45 = vpop.permute.xlu0 %362 }
 0xda1   :  { %499 = vmatmul.msk.f32.vlgmr.msrb.gmra.mxu2 %vm58_vm1, %v363_v45 }
 0xe24   :  { %v383_v47 = vpop.f32.mrf.mxu2 }
 0xe25   :  { %v386_v48 = vadd.f32 %v383_v47, %v360_v46 }
 0xe27   :  { %547 = vtanh.f32 %v386_v48  ;;  %v387_v50 = vmul.f32 0.5, %v386_v48 }
 0xe29   :  { %549 = vtanh.f32 %v387_v50 }
 0xe2d   :  { %v548_v49 = vpop.eup %547 }
 0xe2e   :  { %394 = vrot.lane.b32.xlu1 %v548_v49, %s638_s17 }
 0xe2f   :  { %v550_v51 = vpop.eup %549 }
 0xe30   :  { %v389_v52 = vmul.f32 0.5, %v550_v51 }
 0xe32   :  { %v390_v53 = vadd.f32 0.5, %v389_v52 }
 0xe34   :  { %v392_v56 = vmul.f32 %v390_v53, %v352_v41 }
 0xea0   :  { %v395_v54 = vpop.permute.xlu1 %394 }
 0xea1   :  { %v397_v55 = vmul.f32 %v395_v54, %v390_v53 }
 0xea3   :  { %399 = vrot.lane.b32.xlu2 %v397_v55, %s638_s17 }
 0xefd   :  { %v400_v57 = vpop.permute.xlu2 %399 }
 0xefe   :  { %v402_v58 = vadd.f32 %v400_v57, %v392_v56 }
 0xf00   :  { %551 = vtanh.f32 %v402_v58 }
 0xf06   :  { %v552_v59 = vpop.eup %551 }
 0xf07   :  { %405 = vrot.lane.b32.xlu0 %v552_v59, %s638_s17 }
 0xf79   :  { %v406_v60 = vpop.permute.xlu0 %405 }
 0xf7a   :  { %v408_v61 = vmul.f32 %v406_v60, %v390_v53 }
 0xf7c   :  { %412 = vrot.lane.b32.xlu1 %v408_v61, %s644_s0 }
 0xfee   :  { %v413_v62 = vpop.permute.xlu1 %412 }
 0xfef   :  { %500 = vmatmul.msk.f32.vlgmr.msrb.gmra.mxu3 %vm58_vm1, %v413_v62 }
0x1072   :  { %v433_v0 = vpop.f32.mrf.mxu3 }
0x1073   :  { %v436_v1 = vadd.f32 %v433_v0, %v410_v63 }
0x1075   :  { %553 = vtanh.f32 %v436_v1  ;;  %v437_v3 = vmul.f32 0.5, %v436_v1 }
0x1077   :  { %555 = vtanh.f32 %v437_v3 }
0x107b   :  { %v554_v2 = vpop.eup %553 }
0x107c   :  { %444 = vrot.lane.b32.xlu2 %v554_v2, %s638_s17 }
0x107d   :  { %v556_v4 = vpop.eup %555 }
0x107e   :  { %v439_v5 = vmul.f32 0.5, %v556_v4 }
0x1080   :  { %v440_v6 = vadd.f32 0.5, %v439_v5 }
0x1082   :  { %v442_v9 = vmul.f32 %v440_v6, %v402_v58 }
0x10d6   :  { %v445_v7 = vpop.permute.xlu2 %444 }
0x10d7   :  { %v447_v8 = vmul.f32 %v445_v7, %v440_v6 }
0x10d9   :  { %449 = vrot.lane.b32.xlu0 %v447_v8, %s638_s17 }
0x114b   :  { %v450_v10 = vpop.permute.xlu0 %449 }
0x114c   :  { %v452_v11 = vadd.f32 %v450_v10, %v442_v9 }
0x114e   :  { %557 = vtanh.f32 %v452_v11  ;;  %466 = vrot.lane.b32.xlu0 %v452_v11, %s645_s1 }
0x1154   :  { %v558_v12 = vpop.eup %557 }
0x1155   :  { %455 = vrot.lane.b32.xlu1 %v558_v12, %s638_s17 }
0x11c0   :  { %v467_v13 = vpop.permute.xlu0 %466 }
0x11c1   :  { %469 = vst.msk [vmem:[#allocation3] sm:$0x3] %vm48_vm0, %v467_v13 }
0x11c7   :  { %v456_v14 = vpop.permute.xlu1 %455 }
0x11c8   :  { %v458_v15 = vmul.f32 %v456_v14, %v440_v6 }
0x11ca   :  { %460 = vrot.lane.b32.xlu2 %v458_v15, %s644_s0 }
0x1224   :  { %v461_v16 = vpop.permute.xlu2 %460 }
0x1225   :  { %464 = vst.msk [vmem:[#allocation2] sm:$0x3] %vm48_vm0, %v461_v16 }
0x122c   :  { %v473_v17 = vld [vmem:[#allocation2] sm:$0x3] }
0x122d   :  { %474 = vst.msk [vmem:[#allocation9] sm:$0x3] %vm48_vm0, %v473_v17 }
0x122e   :  { %485 = dma.vmem_to_hbm [thread:$0]  %s481_s24, 32, %s483_s27, [#allocation6]  }
0x122f   :  { %635 = dma.done.wait [#allocation6], 32  }
0x1230   :  { %636 = vsyncadd [#allocation6], 4294967264 }
0x1231   :  { %490 = vsyncpa [#allocation5], 1 }
0x1232   :  { %491 = vsyncpa [#allocation8], 1 }
0x1233   :  { %492 = vsyncpa [#allocation6], 1 }

</bundles_post_ra>
